<compile_context>
chip_gen: v5e
topology: v5e:2x2
jax: 0.10.0
libtpu: 0.0.40
codegen_flags: <defaults>
</compile_context>

<pallas_src>
import functools

import jax
import jax.numpy as jnp
from jax.experimental import pallas as pl
from jax.experimental.pallas import tpu as pltpu

EPS = 1e-5
MM_DTYPE = jnp.bfloat16     # matmul operand dtype (accumulation stays f32)
LANE = 128


def _rup(n, m=LANE):
    return (n + m - 1) // m * m


def _silu(x):
    # x * sigmoid(x); the divide goes to the EUP via approximate reciprocal.
    return x * pl.reciprocal(1.0 + jnp.exp(-x), approx=True)


def _softplus(x):
    return jnp.maximum(x, 0.0) + jnp.log(1.0 + jnp.exp(-jnp.abs(x)))


def mamba_block_kernel(x_ref, norm_w_ref, w_in_ref, b_in_ref, conv_w_ref,
                       conv_b_ref, big_w_ref, big_b_ref, out_w_ref, out_b_ref,
                       o_ref, *, d_model, d2):
    """One grid step processes a (bb*L, Dp) row slab (batch folded into M)."""
    L = conv_b_ref.shape[1]
    M, _ = x_ref.shape
    bb = M // L
    Hp = big_w_ref.shape[0]                       # padded 2*d_model
    Np = (big_w_ref.shape[1] - 2 * Hp) // 2       # padded state_size

    x = x_ref[...]

    # ---- RMSNorm (padded feature columns are zero => sum/d_model == mean) ----
    ms = jnp.sum(x * x, axis=-1, keepdims=True) * (1.0 / d_model)
    xn = x * jax.lax.rsqrt(ms + EPS) * norm_w_ref[...]

    # ---- fused [inp_proj | D] projection; segments are 128-lane aligned ------
    proj = jnp.dot(xn.astype(MM_DTYPE), w_in_ref[...],
                   preferred_element_type=jnp.float32) + b_in_ref[...]
    xp = proj[:, :Hp]            # inp_proj(xn)
    x_res_pre = proj[:, Hp:]     # D(xn)

    # ---- Conv1d(seq_len, seq_len, k=3, pad=1): channel mix over L ------------
    # Neighbor taps via lane rotation + (1, Hp) boundary masks.  Taps are cast
    # to bf16 before stacking so the stack copy moves half the bytes.
    lane = jax.lax.broadcasted_iota(jnp.int32, (1, Hp), 1)
    m_lo = (lane != 0).astype(jnp.float32)           # left zero-pad boundary
    m_hi = (lane != d2 - 1).astype(jnp.float32)      # right zero-pad boundary
    tap_m1 = (pltpu.roll(xp, shift=1, axis=1) * m_lo).astype(MM_DTYPE)
    tap_0 = xp.astype(MM_DTYPE)
    tap_p1 = (pltpu.roll(xp, shift=Hp - 1, axis=1) * m_hi).astype(MM_DTYPE)

    # Single batched contraction (bb,L,3L)x(bb,3L,Hp)->(bb,L,Hp); no Python
    # loop, no per-batch concatenates.  Garbage leaking into padded feature
    # columns is killed by the zero-padded rows of big_w.
    rhs = jnp.concatenate([tap_m1.reshape(bb, L, Hp),
                           tap_0.reshape(bb, L, Hp),
                           tap_p1.reshape(bb, L, Hp)], axis=1)
    conv_w = jnp.broadcast_to(conv_w_ref[...], (bb, L, 3 * L))
    x_conv = (jnp.einsum('blk,bkh->blh', conv_w, rhs,
                         preferred_element_type=jnp.float32)
              + conv_b_ref[...]).reshape(M, Hp)
    x_conv_act = _silu(x_conv)

    # ---- fused [conv_linear | fc1 o clin | fc2 o clin | fc3 o clin] ----------
    big = jnp.dot(x_conv_act.astype(MM_DTYPE), big_w_ref[...],
                  preferred_element_type=jnp.float32) + big_b_ref[...]
    x_conv_out = big[:, :Hp]
    delta = _softplus(big[:, Hp:2 * Hp])
    Bm = big[:, 2 * Hp:2 * Hp + Np]
    Cm = big[:, 2 * Hp + Np:]

    # ---- S6 collapsed: h0 == 0  =>  y = x * delta * sum_n(B_n * C_n) ---------
    bc = jnp.sum(Bm * Cm, axis=-1, keepdims=True)
    y = x_conv_out * delta * bc

    # ---- gate * residual, out_proj -------------------------------------------
    x_comb = _silu(y) * _silu(x_res_pre)
    out = jnp.dot(x_comb.astype(MM_DTYPE), out_w_ref[...],
                  preferred_element_type=jnp.float32) + out_b_ref[...]
    o_ref[...] = out.astype(o_ref.dtype)


def _pick_block_b(batch, seq_len, target_steps=4, max_rows=512):
    """Largest bb dividing batch s.t. rows=bb*L is 8-aligned (or bb==batch),
    rows <= max_rows, and the grid has >= min(target_steps, batch) steps so
    both v7x TensorCores get work and the in/out DMAs pipeline."""
    min_steps = min(target_steps, batch)
    best = None
    for bb in range(1, batch + 1):
        if batch % bb:
            continue
        rows = bb * seq_len
        if rows > max_rows and bb != 1:
            continue
        if rows % 8 and bb != batch:
            continue
        if batch // bb < min_steps:
            continue
        best = bb
    if best is None:
        best = 1 if seq_len % 8 == 0 else batch
    return best


def _pad_to(a, rows, cols):
    return jnp.pad(a, ((0, rows - a.shape[0]), (0, cols - a.shape[1])))


def mamba_block(x, params, block_b=None):
    B, L, D = x.shape
    D2 = 2 * D
    N = params["fc2_w"].shape[1]
    Dp, Hp, Np = _rup(D), _rup(D2), _rup(N)

    bb = block_b if block_b is not None else _pick_block_b(B, L)
    assert B % bb == 0
    rows = bb * L

    f32, mm = jnp.float32, MM_DTYPE

    # ---- weight packing: every output segment padded to a 128-lane multiple --
    norm_w = _pad_to(params["norm_w"].astype(f32), 1, Dp)

    w_in = jnp.concatenate([_pad_to(params["inp_w"], Dp, Hp),
                            _pad_to(params["D_w"], Dp, Hp)], axis=1).astype(mm)
    b_in = jnp.concatenate([_pad_to(params["inp_b"], 1, Hp),
                            _pad_to(params["D_b"], 1, Hp)], axis=1).astype(f32)

    # conv weight (tap, out_ch, in_ch) = (3, L, L) -> (L, 3L), taps along K
    conv_w = jnp.transpose(params["conv_w"], (1, 0, 2)).reshape(L, 3 * L).astype(mm)
    conv_b = jnp.broadcast_to(params["conv_b"].reshape(1, L, 1), (1, L, Hp)).astype(f32)

    # conv_linear -> {fc1, fc2, fc3} chain fused into one matmul; dependent
    # weight products computed in f32, cast to bf16 once.
    clin_w, clin_b = params["clin_w"], params["clin_b"]
    segs = [(clin_w, clin_b, Hp),
            (clin_w @ params["fc1_w"], clin_b @ params["fc1_w"] + params["fc1_b"], Hp),
            (clin_w @ params["fc2_w"], clin_b @ params["fc2_w"] + params["fc2_b"], Np),
            (clin_w @ params["fc3_w"], clin_b @ params["fc3_w"] + params["fc3_b"], Np)]
    big_w = jnp.concatenate([_pad_to(w, Hp, p) for w, _, p in segs], axis=1).astype(mm)
    big_b = jnp.concatenate([_pad_to(b, 1, p) for _, b, p in segs], axis=1).astype(f32)

    out_w = _pad_to(params["out_w"], Hp, Dp).astype(mm)
    out_b = _pad_to(params["out_b"], 1, Dp).astype(f32)

    weights = (norm_w, w_in, b_in, conv_w, conv_b, big_w, big_b, out_w, out_b)
    # NOTE: params["A"] only ever multiplies the all-zero initial state in the
    # reference forward, so the kernel never needs it.

    def full_spec(w):
        # Grid-invariant weights (constant index_map -> fetched once).
        # TODO(synk): mark these single-buffered (pipeline_mode=pl.Buffered(1))
        # once uniformly supported; halves their VMEM footprint on v7x (64 MiB).
        nd = w.ndim
        return pl.BlockSpec(w.shape, lambda i, _nd=nd: (0,) * _nd)

    # Pad the feature axis to a lane multiple so the input/output blocks are
    # lane-dense (no-op when d_model is already a multiple of 128).
    x2 = jnp.pad(x.reshape(B * L, D), ((0, 0), (0, Dp - D)))

    # VMEM budget re-derived from shapes (double-buffered weights + io blocks +
    # live f32 activation temporaries), clamped to v7x's 64 MiB physical VMEM.
    w_bytes = sum(int(w.size) * w.dtype.itemsize for w in weights)
    act_bytes = rows * 4 * (2 * Dp + 4 * Hp + 3 * Hp + (2 * Hp + 2 * Np) + 4 * Hp)
    vmem_limit = int(min(max(2 * (2 * w_bytes + 2 * act_bytes), 32 * 1024 * 1024),
                         64 * 1024 * 1024))
    # TODO(synk): at very large seq_len/d_model the conv / fused weights need an
    # extra "arbitrary" grid axis tiling their output columns to stay under
    # v7x's 64 MiB VMEM; not needed at these shapes.

    kernel = functools.partial(mamba_block_kernel, d_model=D, d2=D2)
    out2 = pl.pallas_call(
        kernel,
        out_shape=jax.ShapeDtypeStruct((B * L, Dp), x.dtype),
        grid=(B // bb,),
        in_specs=[pl.BlockSpec((rows, Dp), lambda i: (i, 0))]
                 + [full_spec(w) for w in weights],
        out_specs=pl.BlockSpec((rows, Dp), lambda i: (i, 0)),
        compiler_params=pltpu.CompilerParams(
            dimension_semantics=("parallel",),
            vmem_limit_bytes=vmem_limit,
        ),
    )(x2, *weights)
    return out2[:, :D].reshape(B, L, D)


def init_params(key, L, D, N):
    D2 = 2 * D
    ks = jax.random.split(key, 16)
    u = lambda k, shape, s=0.1: jax.random.uniform(k, shape, jnp.float32, -s, s)
    return {
        # RMSNorm weight initialized to ones (as in the module)
        "norm_w": jnp.ones((1, D), jnp.float32),
        # Linear weights stored pre-transposed: (in, out), so kernel does x @ W + b
        "inp_w": u(ks[0], (D, D2)),   "inp_b": u(ks[1], (1, D2)),
        # Conv1d weight stored as (k, out_ch, in_ch) = (3, L, L); bias (L, 1)
        "conv_w": u(ks[2], (3, L, L)), "conv_b": u(ks[3], (L, 1)),
        "clin_w": u(ks[4], (D2, D2)), "clin_b": u(ks[5], (1, D2)),
        "fc1_w": u(ks[6], (D2, D2)),  "fc1_b": u(ks[7], (1, D2)),
        "fc2_w": u(ks[8], (D2, N)),   "fc2_b": u(ks[9], (1, N)),
        "fc3_w": u(ks[10], (D2, N)),  "fc3_b": u(ks[11], (1, N)),
        "A": u(ks[12], (D2, N), 0.3),
        "D_w": u(ks[13], (D, D2)),    "D_b": u(ks[14], (1, D2)),
        "out_w": u(ks[15], (D2, D)),
        # out_proj bias constant-initialized to 1.0 (as in the module)
        "out_b": jnp.ones((1, D), jnp.float32),
    }


def mamba_block_reference(x, p, matmul_dtype=jnp.float32):
    """Pure-JAX mirror of the PyTorch forward (full S6 path), for verification."""
    def mm(a, w):
        return jnp.dot(a.astype(matmul_dtype), w.astype(matmul_dtype),
                       preferred_element_type=jnp.float32)

    xn = x * jax.lax.rsqrt(jnp.mean(x * x, -1, keepdims=True) + EPS) * p["norm_w"][0]
    xp = mm(xn, p["inp_w"]) + p["inp_b"][0]
    D2 = xp.shape[-1]
    xp_pad = jnp.pad(xp, ((0, 0), (0, 0), (1, 1)))
    x_conv = sum(jnp.einsum("ij,bjt->bit",
                            p["conv_w"][k].astype(matmul_dtype),
                            xp_pad[:, :, k:k + D2].astype(matmul_dtype),
                            preferred_element_type=jnp.float32)
                 for k in range(3)) + p["conv_b"][:, 0][None, :, None]
    x_conv_act = jax.nn.silu(x_conv)
    x_conv_out = mm(x_conv_act, p["clin_w"]) + p["clin_b"][0]
    Bm = mm(x_conv_out, p["fc2_w"]) + p["fc2_b"][0]
    Cm = mm(x_conv_out, p["fc3_w"]) + p["fc3_b"][0]
    delta = jax.nn.softplus(mm(x_conv_out, p["fc1_w"]) + p["fc1_b"][0])
    dB = jnp.einsum("bld,bln->bldn", delta, Bm)
    dA = jnp.exp(jnp.einsum("bld,dn->bldn", delta, p["A"]))
    h = jnp.zeros_like(dB)
    h = dA * h + x_conv_out[..., None] * dB
    y = jnp.einsum("bln,bldn->bld", Cm, h)
    x_act = jax.nn.silu(y)
    x_res = jax.nn.silu(mm(xn, p["D_w"]) + p["D_b"][0])
    return mm(x_act * x_res, p["out_w"]) + p["out_b"][0]


if __name__ == "__main__":
    B, L, D, N = 2, 8, 32, 16   # batch, seq_len, d_model, state_size
    key = jax.random.PRNGKey(0)
    kx, kp = jax.random.split(key)
    params = init_params(kp, L, D, N)
    x = jax.random.normal(kx, (B, L, D), jnp.float32)

    out = jax.jit(mamba_block)(x, params)
    jax.block_until_ready(out)
    assert out.shape == (B, L, D)

    # Check against a matched-precision (bf16-operand) reference.
    ref_bf16 = mamba_block_reference(x, params, MM_DTYPE)
    err = float(jnp.max(jnp.abs(out - ref_bf16)))
    assert err < 5e-3, f"mismatch vs matched-precision reference: {err}"

    # Looser sanity check against the full-f32 reference.
    ref_f32 = mamba_block_reference(x, params, jnp.float32)
    err32 = float(jnp.max(jnp.abs(out - ref_f32)))
    assert err32 < 5e-2, f"mismatch vs f32 reference: {err32}"

    print("KERNEL_OK")
</pallas_src>

<mosaic_0001>
module attributes {stable_mosaic.version = 11 : i64} {
  func.func @mamba_block_kernel(%arg0: i32, %arg1: memref<8x128xf32, #tpu.memory_space<vmem>>, %arg2: memref<1x128xf32, #tpu.memory_space<vmem>>, %arg3: memref<128x256xbf16, #tpu.memory_space<vmem>>, %arg4: memref<1x256xf32, #tpu.memory_space<vmem>>, %arg5: memref<8x24xbf16, #tpu.memory_space<vmem>>, %arg6: memref<1x8x128xf32, #tpu.memory_space<vmem>>, %arg7: memref<128x512xbf16, #tpu.memory_space<vmem>>, %arg8: memref<1x512xf32, #tpu.memory_space<vmem>>, %arg9: memref<128x128xbf16, #tpu.memory_space<vmem>>, %arg10: memref<1x128xf32, #tpu.memory_space<vmem>>, %arg11: memref<8x128xf32, #tpu.memory_space<vmem>>) attributes {dimension_semantics = [#tpu.dimension_semantics<parallel>], iteration_bounds = array<i64: 2>, scalar_prefetch = 0 : i64, scratch_operands = 0 : i64, tpu.core_type = #tpu.core_type<tc>, window_params = [{transform_indices = @transform_0, window_bounds = array<i64: 8, 128>}, {pipeline_mode = #tpu.pipeline_mode<synchronous>, transform_indices = @transform_1, window_bounds = array<i64: 1, 128>}, {pipeline_mode = #tpu.pipeline_mode<synchronous>, transform_indices = @transform_2, window_bounds = array<i64: 128, 256>}, {pipeline_mode = #tpu.pipeline_mode<synchronous>, transform_indices = @transform_3, window_bounds = array<i64: 1, 256>}, {pipeline_mode = #tpu.pipeline_mode<synchronous>, transform_indices = @transform_4, window_bounds = array<i64: 8, 24>}, {pipeline_mode = #tpu.pipeline_mode<synchronous>, transform_indices = @transform_5, window_bounds = array<i64: 1, 8, 128>}, {pipeline_mode = #tpu.pipeline_mode<synchronous>, transform_indices = @transform_6, window_bounds = array<i64: 128, 512>}, {pipeline_mode = #tpu.pipeline_mode<synchronous>, transform_indices = @transform_7, window_bounds = array<i64: 1, 512>}, {pipeline_mode = #tpu.pipeline_mode<synchronous>, transform_indices = @transform_8, window_bounds = array<i64: 128, 128>}, {pipeline_mode = #tpu.pipeline_mode<synchronous>, transform_indices = @transform_9, window_bounds = array<i64: 1, 128>}, {transform_indices = @transform_10, window_bounds = array<i64: 8, 128>}]} {
    %c0 = arith.constant 0 : index
    %c0_0 = arith.constant 0 : index
    %0 = vector.load %arg1[%c0, %c0_0] : memref<8x128xf32, #tpu.memory_space<vmem>>, vector<8x128xf32>
    %1 = arith.mulf %0, %0 : vector<8x128xf32>
    %cst = arith.constant dense<0.000000e+00> : vector<8xf32>
    %2 = vector.multi_reduction <add>, %1, %cst [1] : vector<8x128xf32> to vector<8xf32>
    %3 = vector.shape_cast %2 : vector<8xf32> to vector<8x1xf32>
    %cst_1 = arith.constant 3.125000e-02 : f32
    %4 = vector.broadcast %cst_1 : f32 to vector<8x1xf32>
    %5 = arith.mulf %3, %4 : vector<8x1xf32>
    %cst_2 = arith.constant 9.99999974E-6 : f32
    %6 = vector.broadcast %cst_2 : f32 to vector<8x1xf32>
    %7 = arith.addf %5, %6 : vector<8x1xf32>
    %8 = math.rsqrt %7 : vector<8x1xf32>
    %9 = vector.broadcast %8 : vector<8x1xf32> to vector<8x128xf32>
    %10 = arith.mulf %0, %9 : vector<8x128xf32>
    %c0_3 = arith.constant 0 : index
    %c0_4 = arith.constant 0 : index
    %11 = vector.load %arg2[%c0_3, %c0_4] : memref<1x128xf32, #tpu.memory_space<vmem>>, vector<1x128xf32>
    %12 = vector.broadcast %11 : vector<1x128xf32> to vector<8x128xf32>
    %13 = arith.mulf %10, %12 : vector<8x128xf32>
    %14 = arith.truncf %13 : vector<8x128xf32> to vector<8x128xbf16>
    %c0_5 = arith.constant 0 : index
    %c0_6 = arith.constant 0 : index
    %15 = vector.load %arg3[%c0_5, %c0_6] : memref<128x256xbf16, #tpu.memory_space<vmem>>, vector<128x256xbf16>
    %cst_7 = arith.constant dense<0.000000e+00> : vector<8x256xf32>
    %16 = tpu.matmul %14, %15, %cst_7 {dimension_numbers = #tpu.dot_dimension_numbers<[1], [0], [0], [1], [0, 0, 1, 1], [], []>} : vector<8x128xbf16>, vector<128x256xbf16>, vector<8x256xf32> -> vector<8x256xf32>
    %c0_8 = arith.constant 0 : index
    %c0_9 = arith.constant 0 : index
    %17 = vector.load %arg4[%c0_8, %c0_9] : memref<1x256xf32, #tpu.memory_space<vmem>>, vector<1x256xf32>
    %18 = vector.broadcast %17 : vector<1x256xf32> to vector<8x256xf32>
    %19 = arith.addf %16, %18 : vector<8x256xf32>
    %20 = vector.extract_strided_slice %19 {offsets = [0, 0], sizes = [8, 128], strides = [1, 1]} : vector<8x256xf32> to vector<8x128xf32>
    %21 = vector.extract_strided_slice %19 {offsets = [0, 128], sizes = [8, 128], strides = [1, 1]} : vector<8x256xf32> to vector<8x128xf32>
    %22 = tpu.iota {dimensions = array<i32: 1>} : vector<1x128xi32>
    %c0_i32 = arith.constant 0 : i32
    %23 = vector.broadcast %c0_i32 : i32 to vector<1x128xi32>
    %24 = arith.cmpi ne, %22, %23 : vector<1x128xi32>
    %25 = arith.extui %24 : vector<1x128xi1> to vector<1x128xi32>
    %26 = arith.sitofp %25 : vector<1x128xi32> to vector<1x128xf32>
    %c63_i32 = arith.constant 63 : i32
    %27 = vector.broadcast %c63_i32 : i32 to vector<1x128xi32>
    %28 = arith.cmpi ne, %22, %27 : vector<1x128xi32>
    %29 = arith.extui %28 : vector<1x128xi1> to vector<1x128xi32>
    %30 = arith.sitofp %29 : vector<1x128xi32> to vector<1x128xf32>
    %c1_i32 = arith.constant 1 : i32
    %31 = tpu.dynamic_rotate %20 by %c1_i32 dim 1 : vector<8x128xf32>, i32 -> vector<8x128xf32>
    %32 = vector.broadcast %26 : vector<1x128xf32> to vector<8x128xf32>
    %33 = arith.mulf %31, %32 : vector<8x128xf32>
    %34 = arith.truncf %33 : vector<8x128xf32> to vector<8x128xbf16>
    %35 = arith.truncf %20 : vector<8x128xf32> to vector<8x128xbf16>
    %c127_i32 = arith.constant 127 : i32
    %36 = tpu.dynamic_rotate %20 by %c127_i32 dim 1 : vector<8x128xf32>, i32 -> vector<8x128xf32>
    %37 = vector.broadcast %30 : vector<1x128xf32> to vector<8x128xf32>
    %38 = arith.mulf %36, %37 : vector<8x128xf32>
    %39 = arith.truncf %38 : vector<8x128xf32> to vector<8x128xbf16>
    %40 = vector.shape_cast %34 : vector<8x128xbf16> to vector<1x8x128xbf16>
    %41 = vector.shape_cast %35 : vector<8x128xbf16> to vector<1x8x128xbf16>
    %42 = vector.shape_cast %39 : vector<8x128xbf16> to vector<1x8x128xbf16>
    %43 = tpu.concatenate %40, %41, %42 in 1 : vector<1x8x128xbf16>, vector<1x8x128xbf16>, vector<1x8x128xbf16> -> vector<1x24x128xbf16>
    %c0_10 = arith.constant 0 : index
    %c0_11 = arith.constant 0 : index
    %44 = vector.load %arg5[%c0_10, %c0_11] : memref<8x24xbf16, #tpu.memory_space<vmem>>, vector<8x24xbf16>
    %45 = vector.shape_cast %44 : vector<8x24xbf16> to vector<1x8x24xbf16>
    "tpu.trace_start"() <{level = 10 : i32, message = "blk,bkh->blh"}> : () -> ()
    %cst_12 = arith.constant dense<0.000000e+00> : vector<1x8x128xf32>
    %46 = tpu.matmul %45, %43, %cst_12 {dimension_numbers = #tpu.dot_dimension_numbers<[2], [1], [1], [2], [0, 0, 0, 1, 1, 2], [0], [0]>} : vector<1x8x24xbf16>, vector<1x24x128xbf16>, vector<1x8x128xf32> -> vector<1x8x128xf32>
    "tpu.trace_stop"() : () -> ()
    %c0_13 = arith.constant 0 : index
    %c0_14 = arith.constant 0 : index
    %c0_15 = arith.constant 0 : index
    %47 = vector.load %arg6[%c0_13, %c0_14, %c0_15] : memref<1x8x128xf32, #tpu.memory_space<vmem>>, vector<1x8x128xf32>
    %48 = arith.addf %46, %47 : vector<1x8x128xf32>
    %49 = vector.shape_cast %48 : vector<1x8x128xf32> to vector<8x128xf32>
    %cst_16 = arith.constant 0.000000e+00 : f32
    %50 = vector.broadcast %cst_16 : f32 to vector<8x128xf32>
    %51 = arith.subf %50, %49 : vector<8x128xf32>
    %52 = math.exp %51 : vector<8x128xf32>
    %cst_17 = arith.constant 1.000000e+00 : f32
    %53 = vector.broadcast %cst_17 : f32 to vector<8x128xf32>
    %54 = arith.addf %53, %52 : vector<8x128xf32>
    %55 = tpu.reciprocal %54 {approx = true} : vector<8x128xf32> -> vector<8x128xf32>
    %56 = arith.mulf %49, %55 : vector<8x128xf32>
    %57 = arith.truncf %56 : vector<8x128xf32> to vector<8x128xbf16>
    %c0_18 = arith.constant 0 : index
    %c0_19 = arith.constant 0 : index
    %58 = vector.load %arg7[%c0_18, %c0_19] : memref<128x512xbf16, #tpu.memory_space<vmem>>, vector<128x512xbf16>
    %cst_20 = arith.constant dense<0.000000e+00> : vector<8x512xf32>
    %59 = tpu.matmul %57, %58, %cst_20 {dimension_numbers = #tpu.dot_dimension_numbers<[1], [0], [0], [1], [0, 0, 1, 1], [], []>} : vector<8x128xbf16>, vector<128x512xbf16>, vector<8x512xf32> -> vector<8x512xf32>
    %c0_21 = arith.constant 0 : index
    %c0_22 = arith.constant 0 : index
    %60 = vector.load %arg8[%c0_21, %c0_22] : memref<1x512xf32, #tpu.memory_space<vmem>>, vector<1x512xf32>
    %61 = vector.broadcast %60 : vector<1x512xf32> to vector<8x512xf32>
    %62 = arith.addf %59, %61 : vector<8x512xf32>
    %63 = vector.extract_strided_slice %62 {offsets = [0, 0], sizes = [8, 128], strides = [1, 1]} : vector<8x512xf32> to vector<8x128xf32>
    %64 = vector.extract_strided_slice %62 {offsets = [0, 128], sizes = [8, 128], strides = [1, 1]} : vector<8x512xf32> to vector<8x128xf32>
    %cst_23 = arith.constant 0.000000e+00 : f32
    %65 = vector.broadcast %cst_23 : f32 to vector<8x128xf32>
    %66 = arith.maximumf %64, %65 : vector<8x128xf32>
    %67 = math.absf %64 : vector<8x128xf32>
    %cst_24 = arith.constant 0.000000e+00 : f32
    %68 = vector.broadcast %cst_24 : f32 to vector<8x128xf32>
    %69 = arith.subf %68, %67 : vector<8x128xf32>
    %70 = math.exp %69 : vector<8x128xf32>
    %cst_25 = arith.constant 1.000000e+00 : f32
    %71 = vector.broadcast %cst_25 : f32 to vector<8x128xf32>
    %72 = arith.addf %71, %70 : vector<8x128xf32>
    %73 = math.log %72 : vector<8x128xf32>
    %74 = arith.addf %66, %73 : vector<8x128xf32>
    %75 = vector.extract_strided_slice %62 {offsets = [0, 256], sizes = [8, 128], strides = [1, 1]} : vector<8x512xf32> to vector<8x128xf32>
    %76 = vector.extract_strided_slice %62 {offsets = [0, 384], sizes = [8, 128], strides = [1, 1]} : vector<8x512xf32> to vector<8x128xf32>
    %77 = arith.mulf %75, %76 : vector<8x128xf32>
    %cst_26 = arith.constant dense<0.000000e+00> : vector<8xf32>
    %78 = vector.multi_reduction <add>, %77, %cst_26 [1] : vector<8x128xf32> to vector<8xf32>
    %79 = vector.shape_cast %78 : vector<8xf32> to vector<8x1xf32>
    %80 = arith.mulf %63, %74 : vector<8x128xf32>
    %81 = vector.broadcast %79 : vector<8x1xf32> to vector<8x128xf32>
    %82 = arith.mulf %80, %81 : vector<8x128xf32>
    %cst_27 = arith.constant 0.000000e+00 : f32
    %83 = vector.broadcast %cst_27 : f32 to vector<8x128xf32>
    %84 = arith.subf %83, %82 : vector<8x128xf32>
    %85 = math.exp %84 : vector<8x128xf32>
    %cst_28 = arith.constant 1.000000e+00 : f32
    %86 = vector.broadcast %cst_28 : f32 to vector<8x128xf32>
    %87 = arith.addf %86, %85 : vector<8x128xf32>
    %88 = tpu.reciprocal %87 {approx = true} : vector<8x128xf32> -> vector<8x128xf32>
    %89 = arith.mulf %82, %88 : vector<8x128xf32>
    %cst_29 = arith.constant 0.000000e+00 : f32
    %90 = vector.broadcast %cst_29 : f32 to vector<8x128xf32>
    %91 = arith.subf %90, %21 : vector<8x128xf32>
    %92 = math.exp %91 : vector<8x128xf32>
    %cst_30 = arith.constant 1.000000e+00 : f32
    %93 = vector.broadcast %cst_30 : f32 to vector<8x128xf32>
    %94 = arith.addf %93, %92 : vector<8x128xf32>
    %95 = tpu.reciprocal %94 {approx = true} : vector<8x128xf32> -> vector<8x128xf32>
    %96 = arith.mulf %21, %95 : vector<8x128xf32>
    %97 = arith.mulf %89, %96 : vector<8x128xf32>
    %98 = arith.truncf %97 : vector<8x128xf32> to vector<8x128xbf16>
    %c0_31 = arith.constant 0 : index
    %c0_32 = arith.constant 0 : index
    %99 = vector.load %arg9[%c0_31, %c0_32] : memref<128x128xbf16, #tpu.memory_space<vmem>>, vector<128x128xbf16>
    %cst_33 = arith.constant dense<0.000000e+00> : vector<8x128xf32>
    %100 = tpu.matmul %98, %99, %cst_33 {dimension_numbers = #tpu.dot_dimension_numbers<[1], [0], [0], [1], [0, 0, 1, 1], [], []>} : vector<8x128xbf16>, vector<128x128xbf16>, vector<8x128xf32> -> vector<8x128xf32>
    %c0_34 = arith.constant 0 : index
    %c0_35 = arith.constant 0 : index
    %101 = vector.load %arg10[%c0_34, %c0_35] : memref<1x128xf32, #tpu.memory_space<vmem>>, vector<1x128xf32>
    %102 = vector.broadcast %101 : vector<1x128xf32> to vector<8x128xf32>
    %103 = arith.addf %100, %102 : vector<8x128xf32>
    %c0_36 = arith.constant 0 : index
    %c0_37 = arith.constant 0 : index
    %104 = vector.load %arg11[%c0_36, %c0_37] : memref<8x128xf32, #tpu.memory_space<vmem>>, vector<8x128xf32>
    tpu.vector_store %arg11[%c0_36, %c0_37], %103 {strides = array<i32>} : memref<8x128xf32, #tpu.memory_space<vmem>>, vector<8x128xf32>,
    return
  }
  func.func @transform_0(%arg0: i32) -> (i32, i32) {
    %c0_i32 = arith.constant 0 : i32
    %c0_i32_0 = arith.constant 0 : i32
    return %arg0, %c0_i32 : i32, i32
  }
  func.func @transform_1(%arg0: i32) -> (i32, i32) {
    %c0_i32 = arith.constant 0 : i32
    %c0_i32_0 = arith.constant 0 : i32
    %c0_i32_1 = arith.constant 0 : i32
    return %c0_i32, %c0_i32_0 : i32, i32
  }
  func.func @transform_2(%arg0: i32) -> (i32, i32) {
    %c0_i32 = arith.constant 0 : i32
    %c0_i32_0 = arith.constant 0 : i32
    %c0_i32_1 = arith.constant 0 : i32
    return %c0_i32, %c0_i32_0 : i32, i32
  }
  func.func @transform_3(%arg0: i32) -> (i32, i32) {
    %c0_i32 = arith.constant 0 : i32
    %c0_i32_0 = arith.constant 0 : i32
    %c0_i32_1 = arith.constant 0 : i32
    return %c0_i32, %c0_i32_0 : i32, i32
  }
  func.func @transform_4(%arg0: i32) -> (i32, i32) {
    %c0_i32 = arith.constant 0 : i32
    %c0_i32_0 = arith.constant 0 : i32
    %c0_i32_1 = arith.constant 0 : i32
    return %c0_i32, %c0_i32_0 : i32, i32
  }
  func.func @transform_5(%arg0: i32) -> (i32, i32, i32) {
    %c0_i32 = arith.constant 0 : i32
    %c0_i32_0 = arith.constant 0 : i32
    %c0_i32_1 = arith.constant 0 : i32
    %c0_i32_2 = arith.constant 0 : i32
    return %c0_i32, %c0_i32_0, %c0_i32_1 : i32, i32, i32
  }
  func.func @transform_6(%arg0: i32) -> (i32, i32) {
    %c0_i32 = arith.constant 0 : i32
    %c0_i32_0 = arith.constant 0 : i32
    %c0_i32_1 = arith.constant 0 : i32
    return %c0_i32, %c0_i32_0 : i32, i32
  }
  func.func @transform_7(%arg0: i32) -> (i32, i32) {
    %c0_i32 = arith.constant 0 : i32
    %c0_i32_0 = arith.constant 0 : i32
    %c0_i32_1 = arith.constant 0 : i32
    return %c0_i32, %c0_i32_0 : i32, i32
  }
  func.func @transform_8(%arg0: i32) -> (i32, i32) {
    %c0_i32 = arith.constant 0 : i32
    %c0_i32_0 = arith.constant 0 : i32
    %c0_i32_1 = arith.constant 0 : i32
    return %c0_i32, %c0_i32_0 : i32, i32
  }
  func.func @transform_9(%arg0: i32) -> (i32, i32) {
    %c0_i32 = arith.constant 0 : i32
    %c0_i32_0 = arith.constant 0 : i32
    %c0_i32_1 = arith.constant 0 : i32
    return %c0_i32, %c0_i32_0 : i32, i32
  }
  func.func @transform_10(%arg0: i32) -> (i32, i32) {
    %c0_i32 = arith.constant 0 : i32
    %c0_i32_0 = arith.constant 0 : i32
    return %arg0, %c0_i32 : i32, i32
  }
}

</mosaic_0001>

<bundles_post_ra>
// kernel: mamba_block.1
= control target key start
LH: loop header
LB: loop body
LE: loop exit
PB: predicated region body
PF: predicated region fallthrough
CT: control target
= control target key end

     0   :  { %s1367_s13 = smov 0   ;;  %s1733_s0 = inlined_call_operand.vmem [shape: f32[16,128], index: 0, kind: input, shape index: {}]   ;;  %s1734_s1 = inlined_call_operand.vmem [shape: f32[1,128], index: 1, kind: input, shape index: {}]   ;;  %s1735_s2 = inlined_call_operand.vmem [shape: bf16[128,256], index: 2, kind: input, shape index: {}]   ;;  %s1736_s3 = inlined_call_operand.vmem [shape: f32[1,256], index: 3, kind: input, shape index: {}]   ;;  %s1737_s4 = inlined_call_operand.vmem [shape: bf16[8,24], index: 4, kind: input, shape index: {}]   ;;  %s1738_s5 = inlined_call_operand.vmem [shape: f32[1,8,128], index: 5, kind: input, shape index: {}]   ;;  %s1739_s6 = inlined_call_operand.vmem [shape: bf16[128,512], index: 6, kind: input, shape index: {}]   ;;  %s1740_s7 = inlined_call_operand.vmem [shape: f32[1,512], index: 7, kind: input, shape index: {}]   ;;  %s1741_s8 = inlined_call_operand.vmem [shape: bf16[128,128], index: 8, kind: input, shape index: {}]   ;;  %s1742_s9 = inlined_call_operand.vmem [shape: f32[1,128], index: 9, kind: input, shape index: {}]   ;;  %s1743_s10 = inlined_call_operand.vmem [shape: f32[16,128], index: 10, kind: output, shape index: {}]  }
   0x1 LB: > { %s978_s14 = sadd.s32 4294967295, %s1307_s13   ;;  %p982_p0 = scmp.ge.s32.totalorder %s1307_s13, 1  ;;  %s1307_s13 = sphi %s1367_s13, %s20_s13  }
   0x2   : > { %p311_p1 = scmp.lt.s32.totalorder %s1307_s13, 3 }
   0x4   : > { %p312_p2 = pnand %p982_p0, %p311_p1 }
   0x5   : > { %p347_p3 = scmp.lt.s32.totalorder (!%p312_p2), %s978_s14, 1  ;;  %s1309_s18 = smov (!%p312_p2), 1  }
   0x6   : > { %315 = sbr.rel (%p312_p2) target bundleno = 990 (0x3de), region = 60  ;;  %s1310_s19 = smov (!%p312_p2), 127  }
   0xb   : > { %v1043_v0 = vld [vmem:[%s1735_s2 + $0x70] sm:$0xf]  ;;  %v1229_v1 = vld [vmem:[%s1735_s2 + $0x74] sm:$0xf0]  ;;  %v1228_v3 = vld [vmem:[%s1735_s2 + $0x74] sm:$0xf] }
   0xc   : > { %v1044_v2 = vor.u32 %v1229_v1, %v1043_v0  ;;  %v1045_v4 = vld [vmem:[%s1735_s2 + $0x78] sm:$0xf0]  ;;  %s1745_s14 = smov (!%p347_p3, %s978_s14), 1  ;;  %v1035_v8 = vld [vmem:[%s1735_s2 + $0x60] sm:$0xf]  ;;  %vm527_vm5 = vcmask 1043456  }
   0xd   : > { %v1048_v5 = vor.u32 %v1228_v3, %v1045_v4  ;;  %s983_s23 = sshll.u32 %s1745_s14, 3  ;;  %v1227_v9 = vld [vmem:[%s1735_s2 + $0x64] sm:$0xf0]  ;;  %v1226_v10 = vld [vmem:[%s1735_s2 + $0x64] sm:$0xf]  ;;  %vm534_vm6 = vcmask 195584  }
   0xe   : > { %481 = vmatpush.bf16.msra.mxu0 %v1044_v2  ;;  %s350_s26 = scalar_lea.vmem %s1733_s0, %s983_s23  ;;  %v1036_v11 = vor.u32 %v1227_v9, %v1035_v8  ;;  %v1037_v12 = vld [vmem:[%s1735_s2 + $0x68] sm:$0xf0]  ;;  %v1027_v14 = vld [vmem:[%s1735_s2 + $0x50] sm:$0xf]  ;;  %v1225_v15 = vld [vmem:[%s1735_s2 + $0x54] sm:$0xf0]  ;;  %s354_s21 = scalar_lea.vmem %s1743_s10, %s983_s23 }
   0xf   : > { %494 = vmatpush.bf16.msra.mxu1 %v1048_v5  ;;  %v1395_v6 = vld [vmem:[%s350_s26] sm:$0xff]  ;;  %v1040_v13 = vor.u32 %v1226_v10, %v1037_v12  ;;  %v1224_v16 = vld [vmem:[%s1735_s2 + $0x54] sm:$0xf]  ;;  %v1028_v17 = vor.u32 %v1225_v15, %v1027_v14  ;;  %v1029_v18 = vld [vmem:[%s1735_s2 + $0x58] sm:$0xf0] }
  0x10   : > { %v357_v7 = vmul.f32 %v1395_v6, %v1395_v6  ;;  %v1032_v19 = vor.u32 %v1224_v16, %v1029_v18  ;;  %v1019_v20 = vld [vmem:[%s1735_s2 + $0x40] sm:$0xf]  ;;  %v1223_v21 = vld [vmem:[%s1735_s2 + $0x44] sm:$0xf0]  ;;  %v1222_v22 = vld [vmem:[%s1735_s2 + $0x44] sm:$0xf]  ;;  %v507_v16 = vlaneseq }
  0x11   : > { %v1020_v23 = vor.u32 %v1223_v21, %v1019_v20  ;;  %v1021_v24 = vld [vmem:[%s1735_s2 + $0x48] sm:$0xf0]  ;;  %v1011_v26 = vld [vmem:[%s1735_s2 + $0x30] sm:$0xf]  ;;  %v1221_v27 = vld [vmem:[%s1735_s2 + $0x34] sm:$0xf0] }
  0x12   : > { %358 = vadd.xlane.f32.xlu0 %v357_v7  ;;  %482 = vmatpush.bf16.msra.mxu0 %v1036_v11  ;;  %v1024_v25 = vor.u32 %v1222_v22, %v1021_v24  ;;  %v1220_v28 = vld [vmem:[%s1735_s2 + $0x34] sm:$0xf]  ;;  %v1012_v29 = vor.u32 %v1221_v27, %v1011_v26  ;;  %v1013_v30 = vld [vmem:[%s1735_s2 + $0x38] sm:$0xf0]  ;;  %v1003_v32 = vld [vmem:[%s1735_s2 + $0x20] sm:$0xf] }
  0x13   : > { %495 = vmatpush.bf16.msra.mxu1 %v1040_v13  ;;  %v1016_v31 = vor.u32 %v1220_v28, %v1013_v30  ;;  %v1219_v33 = vld [vmem:[%s1735_s2 + $0x24] sm:$0xf0]  ;;  %v1218_v34 = vld [vmem:[%s1735_s2 + $0x24] sm:$0xf]  ;;  %v1005_v36 = vld [vmem:[%s1735_s2 + $0x28] sm:$0xf0] }
  0x14   : > { %v1004_v35 = vor.u32 %v1219_v33, %v1003_v32  ;;  %v1008_v37 = vor.u32 %v1218_v34, %v1005_v36  ;;  %v995_v38 = vld [vmem:[%s1735_s2 + $0x10] sm:$0xf]  ;;  %v1217_v39 = vld [vmem:[%s1735_s2 + $0x14] sm:$0xf0]  ;;  %v1216_v40 = vld [vmem:[%s1735_s2 + $0x14] sm:$0xf] }
  0x15   : > { %v996_v41 = vor.u32 %v1217_v39, %v995_v38  ;;  %v997_v42 = vld [vmem:[%s1735_s2 + $0x18] sm:$0xf0]  ;;  %v987_v43 = vld [vmem:[%s1735_s2] sm:$0xf]  ;;  %v1215_v44 = vld [vmem:[%s1735_s2 + $0x4] sm:$0xf0] }
  0x16   : > { %483 = vmatpush.bf16.msra.mxu0 %v1028_v17  ;;  %v1000_v45 = vor.u32 %v1216_v40, %v997_v42  ;;  %v1214_v46 = vld [vmem:[%s1735_s2 + $0x4] sm:$0xf]  ;;  %v989_v47 = vld [vmem:[%s1735_s2 + $0x8] sm:$0xf0]  ;;  %v988_v48 = vor.u32 %v1215_v44, %v987_v43  ;;  %v1281_v59 = vld [vmem:[%s1734_s1] ss:$0 sm:$0xff] }
  0x17   : > { %496 = vmatpush.bf16.msra.mxu1 %v1032_v19  ;;  %v992_v49 = vor.u32 %v1214_v46, %v989_v47  ;;  %v1490_v0 = vld [vmem:[%s1736_s3] sm:$0x3]  ;;  %v1260_v8 = vld [vmem:[%s1739_s6 + $0xec] sm:$0xf0]  ;;  %v1174_v10 = vld [vmem:[%s1739_s6 + $0xe8] sm:$0xf] }
  0x18   : > { %v397_v1 = vperm.slane %v1490_v0, 0  ;;  %v1166_v7 = vld [vmem:[%s1739_s6 + $0xe0] sm:$0xf]  ;;  %v1261_v11 = vld [vmem:[%s1739_s6 + $0xf4] sm:$0xf0]  ;;  %v508_v17 = vand.u32 127, %v507_v16 }
  0x19   : > { %v1167_v9 = vor.u32 %v1260_v8, %v1166_v7  ;;  %v1175_v12 = vor.u32 %v1261_v11, %v1174_v10  ;;  %v1259_v13 = vld [vmem:[%s1739_s6 + $0xec] sm:$0xf]  ;;  %v1176_v14 = vld [vmem:[%s1739_s6 + $0xf8] sm:$0xf0]  ;;  %v1311_v18 = vmov 0.0  }
  0x1a   : > { %484 = vmatpush.bf16.msra.mxu0 %v1020_v23  ;;  %v1179_v15 = vor.u32 %v1259_v13, %v1176_v14  ;;  %vm509_vm3 = vcmp.ne.s32.totalorder %v508_v17, 0  ;;  %vm512_vm4 = vcmp.ne.s32.totalorder %v508_v17, 63  ;;  %v1258_v28 = vld [vmem:[%s1739_s6 + $0xe4] sm:$0xf]  ;;  %v1150_v36 = vld [vmem:[%s1739_s6 + $0xc0] sm:$0xf] }
  0x1b   : > { %497 = vmatpush.bf16.msra.mxu1 %v1024_v25  ;;  %763 = vmatpush.bf16.msra.mxu3 %v1167_v9  ;;  %v1049_v19 = vsel %vm509_vm3, 1.0, %v1311_v18  ;;  %v1050_v20 = vsel %vm512_vm4, 1.0, %v1311_v18  ;;  %v1254_v38 = vld [vmem:[%s1739_s6 + $0xc4] sm:$0xf]  ;;  %v1152_v40 = vld [vmem:[%s1739_s6 + $0xd0] sm:$0xf0] }
  0x1c   : > { %v1257_v42 = vld [vmem:[%s1739_s6 + $0xd4] sm:$0xf0]  ;;  %v1155_v43 = vor.u32 %v1254_v38, %v1152_v40  ;;  %v1160_v46 = vld [vmem:[%s1739_s6 + $0xd8] sm:$0xf0]  ;;  %v1247_v7 = vld [vmem:[%s1739_s6 + $0x8c] sm:$0xf] }
  0x1d   : > { %v1128_v8 = vld [vmem:[%s1739_s6 + $0x98] sm:$0xf0]  ;;  %v1102_v10 = vld [vmem:[%s1739_s6 + $0x60] sm:$0xf]  ;;  %v1244_v11 = vld [vmem:[%s1739_s6 + $0x6c] sm:$0xf0] }
  0x1e   : > { %485 = vmatpush.bf16.msra.mxu0 %v1012_v29  ;;  %v1168_v29 = vld [vmem:[%s1739_s6 + $0xf0] sm:$0xf0]  ;;  %v1131_v9 = vor.u32 %v1247_v7, %v1128_v8  ;;  %v1103_v13 = vor.u32 %v1244_v11, %v1102_v10  ;;  %v1245_v16 = vld [vmem:[%s1739_s6 + $0x74] sm:$0xf0]  ;;  %v593_v8 = vld [vmem:[%s1740_s7] sm:$0xf] }
  0x1f   : > { %498 = vmatpush.bf16.msra.mxu1 %v1016_v31  ;;  %v1171_v33 = vor.u32 %v1258_v28, %v1168_v29  ;;  %v1104_v14 = vld [vmem:[%s1739_s6 + $0x70] sm:$0xf0]  ;;  %v1241_v28 = vld [vmem:[%s1739_s6 + $0x54] sm:$0xf0]  ;;  %v598_v10 = vperm.slane %v593_v8, 3 }
  0x20   : > { %v1072_v38 = vld [vmem:[%s1739_s6 + $0x30] sm:$0xf0]  ;;  %v1237_v40 = vld [vmem:[%s1739_s6 + $0x34] sm:$0xf0] }
  0x21   : > { %v1269_v7 = vld [vmem:[%s1741_s8 + $0x38] sm:$0xff] }
  0x22   : > { %486 = vmatpush.bf16.msra.mxu0 %v1004_v35  ;;  %v532_v35 = vld [vmem:[%s1737_s4] sm:$0xf] }
  0x23   : > { %499 = vmatpush.bf16.msra.mxu1 %v1008_v37  ;;  %v1256_v37 = vld [vmem:[%s1739_s6 + $0xcc] sm:$0xf0] }
  0x24   : > { %v1151_v39 = vor.u32 %v1256_v37, %v1150_v36  ;;  %v1234_v36 = vld [vmem:[%s1739_s6 + $0x24] sm:$0xf] }
  0x26   : > { %487 = vmatpush.bf16.msra.mxu0 %v996_v41  ;;  %v1158_v41 = vld [vmem:[%s1739_s6 + $0xc8] sm:$0xf]  ;;  %764 = vmatpush.bf16.msra.mxu3 %v1151_v39 }
  0x27   : > { %500 = vmatpush.bf16.msra.mxu1 %v1000_v45  ;;  %v1159_v44 = vor.u32 %v1257_v42, %v1158_v41  ;;  %v1255_v45 = vld [vmem:[%s1739_s6 + $0xcc] sm:$0xf]  ;;  %v1078_v39 = vld [vmem:[%s1739_s6 + $0x28] sm:$0xf]  ;;  %v1075_v41 = vor.u32 %v1234_v36, %v1072_v38  ;;  %v1268_v36 = vld [vmem:[%s1741_s8 + $0x30] sm:$0xff] }
  0x28   : > { %v1163_v47 = vor.u32 %v1255_v45, %v1160_v46  ;;  %v1079_v42 = vor.u32 %v1237_v40, %v1078_v39  ;;  %v1054_v46 = vld [vmem:[%s1739_s6] sm:$0xf]  ;;  %v1265_v39 = vld [vmem:[%s1741_s8 + $0x18] sm:$0xff]  ;;  %v1264_v40 = vld [vmem:[%s1741_s8 + $0x10] sm:$0xff] }
  0x29   : > { %v1266_v38 = vld [vmem:[%s1741_s8 + $0x20] sm:$0xff] }
  0x2a   : > { %488 = vmatpush.bf16.msra.mxu0 %v988_v48  ;;  %v1134_v48 = vld [vmem:[%s1739_s6 + $0xa0] sm:$0xf] }
  0x2b   : > { %501 = vmatpush.bf16.msra.mxu1 %v992_v49  ;;  %v1252_v49 = vld [vmem:[%s1739_s6 + $0xac] sm:$0xf0] }
  0x2e   : > { %789 = vmatpush.bf16.msrb.mxu0 %v1175_v12  ;;  %v1242_v12 = vld [vmem:[%s1739_s6 + $0x64] sm:$0xf] }
  0x2f   : > { %802 = vmatpush.bf16.msrb.mxu1 %v1179_v15  ;;  %v1110_v15 = vld [vmem:[%s1739_s6 + $0x68] sm:$0xf]  ;;  %v1107_v17 = vor.u32 %v1242_v12, %v1104_v14 }
  0x30   : > { %v1111_v18 = vor.u32 %v1245_v16, %v1110_v15  ;;  %v596_v15 = vperm.slane %v593_v8, 1 }
  0x32   : > { %790 = vmatpush.bf16.msrb.mxu0 %v1159_v44  ;;  %v1080_v44 = vld [vmem:[%s1739_s6 + $0x38] sm:$0xf0] }
  0x33   : > { %803 = vmatpush.bf16.msrb.mxu1 %v1163_v47  ;;  %v1232_v47 = vld [vmem:[%s1739_s6 + $0xc] sm:$0xf0] }
  0x85   : > { %v359_v50 = vpop.xlane.xlu0 %358 }
  0x86   : > { %v360_v51 = vmul.f32 0.03125, %v359_v50  ;;  %v1250_v50 = vld [vmem:[%s1739_s6 + $0xa4] sm:$0xf] }
  0x88   : > { %v361_v52 = vadd.f32 1e-05, %v360_v51  ;;  %v1135_v51 = vor.u32 %v1252_v49, %v1134_v48  ;;  %v1230_v48 = vld [vmem:[%s1739_s6 + $0x4] sm:$0xf]  ;;  %v1055_v49 = vor.u32 %v1232_v47, %v1054_v46 }
  0x8a   : > { %1283 = vrsqrt.f32 %v361_v52  ;;  %vm368_vm1 = vweird.f32 %v361_v52  ;;  %765 = vmatpush.bf16.msra.mxu3 %v1135_v51  ;;  %v1062_v51 = vld [vmem:[%s1739_s6 + $0x8] sm:$0xf] }
  0x90   : > { %v1284_v53 = vpop.eup %1283 }
  0x91   : > { %v363_v54 = vmul.f32 %v1284_v53, %v361_v52  ;;  %vm369_vm0 = vweird.f32 %v1284_v53  ;;  %v1136_v52 = vld [vmem:[%s1739_s6 + $0xb0] sm:$0xf0] }
  0x92   : > { %vm370_vm2 = vmor %vm368_vm1, %vm369_vm0 }
  0x93   : > { %v364_v55 = vmul.f32 %v1284_v53, %v363_v54  ;;  %v1253_v54 = vld [vmem:[%s1739_s6 + $0xb4] sm:$0xf0] }
  0x95   : > { %v365_v56 = vmul.f32 0.5, %v364_v55  ;;  %v1139_v55 = vor.u32 %v1250_v50, %v1136_v52  ;;  %v1056_v50 = vld [vmem:[%s1739_s6 + $0x10] sm:$0xf0]  ;;  %v1233_v52 = vld [vmem:[%s1739_s6 + $0x14] sm:$0xf0] }
  0x97   : > { %v366_v57 = vsub.f32 1.5, %v365_v56 }
  0x99   : > { %v367_v58 = vmul.f32 %v1284_v53, %v366_v57  ;;  %v1251_v57 = vld [vmem:[%s1739_s6 + $0xac] sm:$0xf] }
  0x9b   : > { %v371_v60 = vsel %vm370_vm2, %v1284_v53, %v367_v58  ;;  %v1142_v53 = vld [vmem:[%s1739_s6 + $0xa8] sm:$0xf]  ;;  %v1144_v58 = vld [vmem:[%s1739_s6 + $0xb8] sm:$0xf0] }
  0x9c   : > { %v372_v61 = vmul.f32 %v371_v60, %v1395_v6  ;;  %v1143_v56 = vor.u32 %v1253_v54, %v1142_v53  ;;  %v1118_v60 = vld [vmem:[%s1739_s6 + $0x80] sm:$0xf]  ;;  %v1059_v53 = vor.u32 %v1230_v48, %v1056_v50  ;;  %v1063_v54 = vor.u32 %v1233_v52, %v1062_v51 }
  0x9e   : > { %v377_v62 = vmul.f32 %v1281_v59, %v372_v61  ;;  %v1147_v59 = vor.u32 %v1251_v57, %v1144_v58  ;;  %791 = vmatpush.bf16.msrb.mxu0 %v1143_v56  ;;  %v1248_v61 = vld [vmem:[%s1739_s6 + $0x8c] sm:$0xf0]  ;;  %v1064_v56 = vld [vmem:[%s1739_s6 + $0x18] sm:$0xf0]  ;;  %v533_v58 = vld [vmem:[%s1738_s5] sm:$0xff] }
  0xa0   : > { %v378_v63 = vpack.c.bf16 %v377_v62, %v377_v62  ;;  %v1246_v62 = vld [vmem:[%s1739_s6 + $0x84] sm:$0xf]  ;;  %804 = vmatpush.bf16.msrb.mxu1 %v1147_v59 }
  0xa2   : > { %489 = vmatmul.bf16.vlgmr.msra.gmra.mxu0 %v378_v63  ;;  %502 = vmatmul.bf16.vlgmr.msra.gmra.mxu1 %v378_v63  ;;  %v1119_v63 = vor.u32 %v1248_v61, %v1118_v60 }
  0xa4   : > { %766 = vmatpush.bf16.msra.mxu3 %v1119_v63  ;;  %805 = vmatpush.bf16.msrb.mxu1 %v1131_v9  ;;  %v597_v9 = vperm.slane %v593_v8, 2 }
  0xa8   : > { %767 = vmatpush.bf16.msra.mxu3 %v1103_v13 }
 0x11f   : > { %v490_v2 = vpop.f32.mrf.mxu0  ;;  %v1493_v3 = vpop.f32.mrf.mxu1 }
 0x120   : > { %v491_v4 = vadd.f32 %v490_v2, %v397_v1  ;;  %v1120_v1 = vld [vmem:[%s1739_s6 + $0x90] sm:$0xf0]  ;;  %v1126_v2 = vld [vmem:[%s1739_s6 + $0x88] sm:$0xf] }
 0x122   : > { %515 = vrot.lane.b32.xlu1 %v491_v4, %s1309_s18  ;;  %520 = vrot.lane.b32.xlu0 %v491_v4, %s1310_s19  ;;  %v519_v21 = vpack.c.bf16 %v491_v4, %v491_v4  ;;  %v1249_v4 = vld [vmem:[%s1739_s6 + $0x94] sm:$0xf0] }
 0x124   : > { %v525_v27 = vunpack.c.l.b16 %v519_v21 }
 0x126   : > { %v526_v32 = vpack.c.b16 %v525_v27, %v525_v27  ;;  %v1094_v27 = vld [vmem:[%s1739_s6 + $0x48] sm:$0xf] }
 0x127   : > { %v492_v5 = vpop.f32.mrf.mxu0  ;;  %v505_v6 = vpop.f32.mrf.mxu1 }
 0x128   : > { %v1123_v5 = vor.u32 %v1246_v62, %v1120_v1  ;;  %v1127_v6 = vor.u32 %v1249_v4, %v1126_v2 }
 0x12a   : > { %792 = vmatpush.bf16.msrb.mxu0 %v1127_v6 }
 0x12e   : > { %793 = vmatpush.bf16.msrb.mxu0 %v1111_v18 }
 0x194   : > { %v516_v22 = vpop.permute.xlu1 %515  ;;  %v521_v23 = vpop.permute.xlu0 %520 }
 0x195   : > { %v517_v24 = vmul.f32 %v1049_v19, %v516_v22  ;;  %v522_v25 = vmul.f32 %v1050_v20, %v521_v23  ;;  %v1243_v19 = vld [vmem:[%s1739_s6 + $0x6c] sm:$0xf]  ;;  %v1112_v20 = vld [vmem:[%s1739_s6 + $0x78] sm:$0xf0]  ;;  %v1086_v22 = vld [vmem:[%s1739_s6 + $0x40] sm:$0xf] }
 0x196   : > { %v1115_v21 = vor.u32 %v1243_v19, %v1112_v20  ;;  %v1240_v23 = vld [vmem:[%s1739_s6 + $0x4c] sm:$0xf0] }
 0x197   : > { %v523_v26 = vpack.c.bf16 %v522_v25, %v522_v25  ;;  %v518_v30 = vpack.c.bf16 %v517_v24, %v517_v24  ;;  %v1238_v24 = vld [vmem:[%s1739_s6 + $0x44] sm:$0xf]  ;;  %v1087_v25 = vor.u32 %v1240_v23, %v1086_v22 }
 0x198   : > { %806 = vmatpush.bf16.msrb.mxu1 %v1115_v21 }
 0x199   : > { %v539_v31 = vsel %vm527_vm5, %v523_v26, 0  ;;  %v530_v34 = vsel %vm527_vm5, %v518_v30, %v526_v32  ;;  %v1088_v26 = vld [vmem:[%s1739_s6 + $0x50] sm:$0xf0]  ;;  %v1095_v30 = vor.u32 %v1241_v28, %v1094_v27  ;;  %v1096_v32 = vld [vmem:[%s1739_s6 + $0x58] sm:$0xf0]  ;;  %768 = vmatpush.bf16.msra.mxu3 %v1087_v25 }
 0x19a   : > { %547 = vmatpush.bf16.msra.mxu2 %v539_v31  ;;  %v1091_v29 = vor.u32 %v1238_v24, %v1088_v26  ;;  %v1239_v31 = vld [vmem:[%s1739_s6 + $0x4c] sm:$0xf] }
 0x19b   : > { %794 = vmatpush.bf16.msrb.mxu0 %v1095_v30 }
 0x19e   : > { %548 = vmatpush.bf16.msra.mxu2 %v530_v34  ;;  %v1070_v34 = vld [vmem:[%s1739_s6 + $0x20] sm:$0xf] }
 0x19f   : > { %795 = vmatpush.bf16.msrb.mxu0 %v1079_v42  ;;  %v1263_v42 = vld [vmem:[%s1741_s8 + $0x8] sm:$0xff] }
 0x1a1   : > { %1051 = vmatmul.msk.bf16.vlgmr.msra.gmra.mxu2 %vm534_vm6, %v532_v35  ;;  %v1236_v35 = vld [vmem:[%s1739_s6 + $0x2c] sm:$0xf0] }
 0x1a2   : > { %776 = vmatpush.bf16.msrb.mxu2 %v1171_v33  ;;  %v1099_v33 = vor.u32 %v1239_v31, %v1096_v32  ;;  %v1071_v37 = vor.u32 %v1236_v35, %v1070_v34 }
 0x1a3   : > { %796 = vmatpush.bf16.msrb.mxu0 %v1063_v54 }
 0x1a4   : > { %807 = vmatpush.bf16.msrb.mxu1 %v1099_v33  ;;  %769 = vmatpush.bf16.msra.mxu3 %v1071_v37  ;;  %v1267_v37 = vld [vmem:[%s1741_s8 + $0x28] sm:$0xff] }
 0x1a6   : > { %777 = vmatpush.bf16.msrb.mxu2 %v1155_v43  ;;  %v1235_v43 = vld [vmem:[%s1739_s6 + $0x2c] sm:$0xf] }
 0x1a7   : > { %v1083_v45 = vor.u32 %v1235_v43, %v1080_v44  ;;  %v1262_v44 = vld [vmem:[%s1741_s8] sm:$0xff] }
 0x1a8   : > { %770 = vmatpush.bf16.msra.mxu3 %v1055_v49 }
 0x1a9   : > { %808 = vmatpush.bf16.msrb.mxu1 %v1083_v45 }
 0x1aa   : > { %778 = vmatpush.bf16.msrb.mxu2 %v1139_v55  ;;  %v1231_v55 = vld [vmem:[%s1739_s6 + $0xc] sm:$0xf] }
 0x1ab   : > { %v1067_v57 = vor.u32 %v1231_v55, %v1064_v56 }
 0x1ac   : > { %911 = vmatpush.bf16.msrb.mxu3 %v1269_v7 }
 0x1ad   : > { %809 = vmatpush.bf16.msrb.mxu1 %v1067_v57 }
 0x1ae   : > { %779 = vmatpush.bf16.msrb.mxu2 %v1123_v5 }
 0x1b0   : > { %912 = vmatpush.bf16.msrb.mxu3 %v1268_v36 }
 0x1b2   : > { %780 = vmatpush.bf16.msrb.mxu2 %v1107_v17 }
 0x1b4   : > { %913 = vmatpush.bf16.msrb.mxu3 %v1267_v37 }
 0x1b6   : > { %781 = vmatpush.bf16.msrb.mxu2 %v1091_v29  ;;  %v595_v29 = vperm.slane %v593_v8, 0 }
 0x1b8   : > { %914 = vmatpush.bf16.msrb.mxu3 %v1266_v38 }
 0x1ba   : > { %782 = vmatpush.bf16.msrb.mxu2 %v1075_v41  ;;  %v398_v41 = vperm.slane %v1490_v0, 1 }
 0x1bc   : > { %915 = vmatpush.bf16.msrb.mxu3 %v1265_v39  ;;  %v504_v43 = vadd.f32 %v1493_v3, %v398_v41 }
 0x1be   : > { %783 = vmatpush.bf16.msrb.mxu2 %v1059_v53  ;;  %v835_v45 = vsub.f32 0.0, %v504_v43 }
 0x1c0   : > { %916 = vmatpush.bf16.msrb.mxu3 %v1264_v40  ;;  %v836_v46 = vmul.f32 1.442695, %v835_v45 }
 0x1c4   : > { %917 = vmatpush.bf16.msrb.mxu3 %v1263_v42 }
 0x1c8   : > { %918 = vmatpush.bf16.msrb.mxu3 %v1262_v44 }
 0x224   : > { %v550_v59 = vpop.f32.mrf.mxu2 }
 0x225   : > { %v551_v60 = vadd.f32 %v550_v59, %v533_v58  ;;  %v1282_v59 = vld [vmem:[%s1742_s9] ss:$0 sm:$0xff] }
 0x227   : > { %v554_v61 = vsub.f32 0.0, %v551_v60 }
 0x229   : > { %v555_v62 = vmul.f32 1.442695, %v554_v61 }
 0x22b   : > { %1285 = vpow2.f32 %v555_v62 }
 0x22c   : > { %v552_v63 = vpop.f32.mrf.mxu2 }
 0x231   : > { %v1286_v1 = vpop.eup %1285 }
 0x232   : > { %v557_v2 = vadd.f32 1.0, %v1286_v1 }
 0x234   : > { %1287 = vrcp.f32 %v557_v2 }
 0x23a   : > { %v1288_v4 = vpop.eup %1287 }
 0x23b   : > { %v559_v5 = vmul.f32 %v1288_v4, %v551_v60 }
 0x23d   : > { %v560_v6 = vpack.c.bf16 %v559_v5, %v559_v5 }
 0x23f   : > { %771 = vmatmul.bf16.vlgmr.msra.gmra.mxu3 %v560_v6  ;;  %784 = vmatmul.bf16.vlgmr.msrb.gmra.mxu2 %v560_v6 }
 0x240   : > { %797 = vmatmul.bf16.vlgmr.msrb.gmra.mxu0 %v560_v6  ;;  %810 = vmatmul.bf16.vlgmr.msrb.gmra.mxu1 %v560_v6 }
 0x2bd   : > { %v798_v11 = vpop.f32.mrf.mxu0  ;;  %v811_v12 = vpop.f32.mrf.mxu1 }
 0x2be   : > { %v799_v13 = vadd.f32 %v798_v11, %v597_v9  ;;  %v812_v14 = vadd.f32 %v811_v12, %v598_v10 }
 0x2c0   : > { %v824_v16 = vmul.f32 %v812_v14, %v799_v13 }
 0x2c2   : > { %825 = vadd.xlane.f32.xlu1 %v824_v16  ;;  %v772_v17 = vpop.f32.mrf.mxu3  ;;  %v785_v18 = vpop.f32.mrf.mxu2 }
 0x2c3   : > { %v786_v19 = vadd.f32 %v785_v18, %v596_v15  ;;  %v773_v33 = vadd.f32 %v772_v17, %v595_v29 }
 0x2c5   : > { %v816_v20 = vand.u32 2147483647, %v786_v19  ;;  %v800_v21 = vpop.f32.mrf.mxu0  ;;  %v813_v22 = vpop.f32.mrf.mxu1  ;;  %v815_v31 = vmax.f32 %v786_v19, 0.0 }
 0x2c7   : > { %v817_v23 = vsub.f32 0.0, %v816_v20 }
 0x2c9   : > { %v818_v24 = vmul.f32 1.442695, %v817_v23 }
 0x2ca   : > { %v774_v25 = vpop.f32.mrf.mxu3  ;;  %v787_v26 = vpop.f32.mrf.mxu2 }
 0x2cb   : > { %1289 = vpow2.f32 %v818_v24 }
 0x2d1   : > { %v1290_v27 = vpop.eup %1289 }
 0x2d2   : > { %v820_v28 = vadd.f32 1.0, %v1290_v27 }
 0x2d4   : > { %1291 = vlog2.f32 %v820_v28 }
 0x2d5   : > { %1293 = vpow2.f32 %v836_v46 }
 0x2da   : > { %v1292_v30 = vpop.eup %1291 }
 0x2db   : > { %v822_v32 = vmul.f32 0.6931472, %v1292_v30  ;;  %v1294_v50 = vpop.eup %1293 }
 0x2dc   : > { %v838_v51 = vadd.f32 1.0, %v1294_v50 }
 0x2dd   : > { %v823_v34 = vadd.f32 %v822_v32, %v815_v31 }
 0x2df   : > { %v827_v35 = vmul.f32 %v823_v34, %v773_v33 }
 0x335   : > { %v826_v47 = vpop.xlane.xlu1 %825 }
 0x336   : > { %v828_v48 = vmul.f32 %v827_v35, %v826_v47 }
 0x338   : > { %v829_v49 = vsub.f32 0.0, %v828_v48 }
 0x33a   : > { %v830_v0 = vmul.f32 1.442695, %v829_v49 }
 0x33c   : > { %1295 = vpow2.f32 %v830_v0 }
 0x33d   : > { %1297 = vrcp.f32 %v838_v51 }
 0x342   : > { %v1296_v52 = vpop.eup %1295 }
 0x343   : > { %v832_v3 = vadd.f32 1.0, %v1296_v52  ;;  %v1298_v53 = vpop.eup %1297 }
 0x344   : > { %v840_v55 = vmul.f32 %v1298_v53, %v504_v43 }
 0x345   : > { %1299 = vrcp.f32 %v832_v3 }
 0x34b   : > { %v1300_v54 = vpop.eup %1299 }
 0x34c   : > { %v834_v56 = vmul.f32 %v1300_v54, %v828_v48 }
 0x34e   : > { %v841_v57 = vmul.f32 %v840_v55, %v834_v56 }
 0x350   : > { %v842_v58 = vpack.c.bf16 %v841_v57, %v841_v57 }
 0x352   : > { %919 = vmatmul.bf16.vlgmr.msrb.gmra.mxu3 %v842_v58 }
 0x3d5   : > { %v920_v60 = vpop.f32.mrf.mxu3 }
 0x3d6   : > { %v921_v61 = vadd.f32 %v1282_v59, %v920_v60 }
 0x3d8   : > { %924 = vst [vmem:[%s354_s21] sm:$0xff] %v921_v61 }
 0x3dd   : > { %v922_v62 = vpop.f32.mrf.mxu3 }
 0x3de PF: > { %s20_s13 = sadd.s32 1, %s1307_s13  }
 0x3df   : > { %p17_p4 = scmp.ge.s32.totalorder %s20_s13, 4  }
 0x3e1   :  { %19 = sbr.rel (!%p17_p4) target bundleno = 1 (0x1), region = 90 }

</bundles_post_ra>
